<compile_context>
chip_gen: v7x
topology: tpu7x:2x2x1
jax: 0.10.0
libtpu: 0.0.40
codegen_flags: <defaults>
</compile_context>

<pallas_src>
import math
import jax
import jax.numpy as jnp
from jax.experimental import pallas as pl
from jax.experimental.pallas import tpu as pltpu


# ----------------------------- model-args / hidden-dim computation -----------------------------

def compute_hidden_dim(dim: int, multiple_of: int, ffn_dim_multiplier):
    hidden_dim = dim * 4
    hidden_dim = int(2 * hidden_dim / 3)
    if ffn_dim_multiplier is not None:
        hidden_dim = int(hidden_dim * ffn_dim_multiplier)
    hidden_dim = (hidden_dim + multiple_of - 1) // multiple_of * multiple_of
    return hidden_dim


def _round_up(x: int, m: int) -> int:
    return (x + m - 1) // m * m


# ----------------------------- Pallas kernel -----------------------------

def ffn_kernel(x_ref, w12_ref, w3_ref, o_ref):
    # x_ref:   (tm, dim)        f32 token tile (cast to bf16 in-kernel; VPU slot is free)
    # w12_ref: (dim, 2*hidden)  bf16 fused [w1^T | w2^T]   (hidden == dim by construction)
    # w3_ref:  (hidden, dim)    bf16 w3^T
    # o_ref:   (tm, dim)        bf16 output tile
    hidden = w3_ref.shape[0]

    x_bf = x_ref[...].astype(w12_ref.dtype)

    # Single fused MXU GEMM for both projections (shared LHS x), f32 accumulation.
    h12 = jnp.dot(x_bf, w12_ref[...], preferred_element_type=jnp.float32)  # (tm, 2*hidden)
    h1 = h12[:, :hidden]                     # static, lane-aligned slices (hidden % 128 == 0)
    h2 = h12[:, hidden:]

    # SiLU(h1) * h2 in f32: sigmoid -> EUP, muls -> VPU. (Kept f32: v5e has no bf16 VPU/EUP;
    # on v6e/v7x a bf16 gating path would further cut vreg pressure at large tiles.)
    gated = (h1 * jax.nn.sigmoid(h1)) * h2                                  # (tm, hidden) f32

    # Third GEMM in bf16 operands / f32 accumulation; store in output dtype (bf16).
    out = jnp.dot(gated.astype(w3_ref.dtype), w3_ref[...],
                  preferred_element_type=jnp.float32)                       # (tm, dim)
    o_ref[...] = out.astype(o_ref.dtype)


# ----------------------------- one-time parameter prep (outside hot path) -----------------------------

def prepare_ffn_params(w1, w2, w3, *, compute_dtype=jnp.bfloat16):
    """w1:(hidden,dim) w2:(dim,hidden) w3:(dim,dim) in PyTorch (out,in) layout.
    Returns fused/transposed/bf16 weights; call ONCE, not per forward."""
    hidden, dim = w1.shape
    assert w2.shape == (dim, hidden)
    assert w3.shape == (dim, dim)
    assert hidden == dim, "reference forward requires hidden_dim == dim"
    w12t = jnp.concatenate([w1.T, w2.T], axis=1).astype(compute_dtype)   # (dim, 2*hidden)
    w3t = w3.T.astype(compute_dtype)                                     # (hidden, dim)
    return jax.block_until_ready(w12t), jax.block_until_ready(w3t)


# ----------------------------- wrapper -----------------------------

def _vmem_limit_bytes() -> int:
    # Generation-aware cap: ~60% of physical VMEM (v7x: 64 MiB -> ~38 MiB; v5e/v6e:
    # 128 MiB -> ~76 MiB), never below the 32 MiB default scoped limit.
    try:
        phys = pltpu.get_tpu_info().vmem_capacity_bytes
    except Exception:
        phys = 64 * 1024 * 1024
    return max(32 * 1024 * 1024, int(phys * 0.6))


def feed_forward_pallas(x, w12t, w3t, *, tm=None, out_dtype=jnp.bfloat16):
    """x: [batch, seq, dim] float32.  w12t: (dim, 2*hidden) bf16, w3t: (hidden, dim) bf16."""
    B, S, dim = x.shape
    two_hidden = w12t.shape[1]
    hidden = two_hidden // 2
    assert w12t.shape == (dim, two_hidden)
    assert w3t.shape == (hidden, dim)
    assert hidden == dim
    assert dim % 128 == 0 and hidden % 128 == 0

    M = B * S
    if tm is None:
        # Fill the MXU for prefill-sized M (256 matches the v6e/v7x 256x256 MXU; two pushes
        # on v5e's 128x128), but shrink to the 16-rounded token count for small/decode M so
        # we never compute or write back padded rows.
        tm = min(256, _round_up(M, 16))
    n_tiles = pl.cdiv(M, tm)
    m_pad = n_tiles * tm

    x2d = x.reshape(M, dim)                      # stays f32; cast happens in-kernel
    if m_pad != M:
        x2d = jnp.pad(x2d, ((0, m_pad - M), (0, 0)))

    w_itemsize = jnp.dtype(w12t.dtype).itemsize
    flops = 2 * m_pad * dim * two_hidden + 2 * m_pad * hidden * dim
    bytes_accessed = (m_pad * dim * 4                           # x in (f32)
                      + dim * two_hidden * w_itemsize           # fused w1/w2
                      + hidden * dim * w_itemsize               # w3
                      + m_pad * dim * jnp.dtype(out_dtype).itemsize)  # out

    out2d = pl.pallas_call(
        ffn_kernel,
        out_shape=jax.ShapeDtypeStruct((m_pad, dim), out_dtype),
        grid_spec=pltpu.PrefetchScalarGridSpec(
            num_scalar_prefetch=0,
            grid=(n_tiles,),
            in_specs=[
                pl.BlockSpec((tm, dim), lambda i: (i, 0)),           # x tile (f32)
                pl.BlockSpec((dim, two_hidden), lambda i: (0, 0)),   # fused [w1^T|w2^T], resident
                pl.BlockSpec((hidden, dim), lambda i: (0, 0)),       # w3^T, resident
            ],
            out_specs=pl.BlockSpec((tm, dim), lambda i: (i, 0)),
        ),
        compiler_params=pltpu.CompilerParams(
            dimension_semantics=("parallel",),
            vmem_limit_bytes=_vmem_limit_bytes()),
        cost_estimate=pl.CostEstimate(
            flops=flops,
            transcendentals=m_pad * hidden,
            bytes_accessed=bytes_accessed),
    )(x2d, w12t, w3t)

    if m_pad != M:
        out2d = out2d[:M]
    return out2d.reshape(B, S, dim)


# ----------------------------- reference (pure JAX, f32) -----------------------------

def feed_forward_ref(x, w1, w2, w3):
    h1 = jnp.einsum("bsd,hd->bsh", x, w1)
    h2 = jnp.einsum("bsh,dh->bsd", x, w2)   # hidden == dim, so shapes line up
    silu = h1 * jax.nn.sigmoid(h1)
    g = silu * h2
    return jnp.einsum("bsd,od->bso", g, w3)


# ----------------------------- main -----------------------------

if __name__ == "__main__":
    # ModelArgs chosen so hidden_dim == dim (required for the reference forward to be valid).
    dim = 256
    multiple_of = 256
    ffn_dim_multiplier = 0.3
    hidden_dim = compute_hidden_dim(dim, multiple_of, ffn_dim_multiplier)
    assert hidden_dim == dim, f"hidden_dim={hidden_dim} must equal dim={dim}"

    batch, seq = 2, 8

    key = jax.random.PRNGKey(0)
    kx, k1, k2, k3 = jax.random.split(key, 4)

    x = jax.random.normal(kx, (batch, seq, dim), dtype=jnp.float32)

    # Deterministic nn.Linear-like init (uniform(-1/sqrt(in), 1/sqrt(in))), weight = (out, in).
    def linear_w(k, out_f, in_f):
        bound = 1.0 / math.sqrt(in_f)
        return jax.random.uniform(k, (out_f, in_f), jnp.float32, -bound, bound)

    w1 = linear_w(k1, hidden_dim, dim)   # Linear(dim, hidden_dim)
    w2 = linear_w(k2, dim, hidden_dim)   # Linear(hidden_dim, dim)
    w3 = linear_w(k3, dim, dim)          # Linear(dim, dim)

    # One-time parameter preparation (transpose + fuse + bf16 cast), outside the hot path.
    w12t, w3t = prepare_ffn_params(w1, w2, w3)

    out = feed_forward_pallas(x, w12t, w3t)
    out = jax.block_until_ready(out)

    ref = feed_forward_ref(x, w1, w2, w3)
    assert out.shape == (batch, seq, dim)
    # bf16 matmul operands + bf16 output vs. f32 reference -> loosened tolerance.
    assert jnp.allclose(out.astype(jnp.float32), ref, atol=2e-2, rtol=2e-2), "mismatch vs. reference"

    print("KERNEL_OK")
</pallas_src>

<mosaic_0001>
module attributes {stable_mosaic.version = 11 : i64} {
  func.func @ffn_kernel(%arg0: i32, %arg1: memref<16x256xf32, #tpu.memory_space<vmem>>, %arg2: memref<256x512xbf16, #tpu.memory_space<vmem>>, %arg3: memref<256x256xbf16, #tpu.memory_space<vmem>>, %arg4: memref<16x256xbf16, #tpu.memory_space<vmem>>) attributes {dimension_semantics = [#tpu.dimension_semantics<parallel>], iteration_bounds = array<i64: 1>, scalar_prefetch = 0 : i64, scratch_operands = 0 : i64, tpu.core_type = #tpu.core_type<tc>, window_params = [{transform_indices = @transform_0, window_bounds = array<i64: 16, 256>}, {pipeline_mode = #tpu.pipeline_mode<synchronous>, transform_indices = @transform_1, window_bounds = array<i64: 256, 512>}, {pipeline_mode = #tpu.pipeline_mode<synchronous>, transform_indices = @transform_2, window_bounds = array<i64: 256, 256>}, {transform_indices = @transform_3, window_bounds = array<i64: 16, 256>}]} {
    %c0 = arith.constant 0 : index
    %c0_0 = arith.constant 0 : index
    %0 = vector.load %arg1[%c0, %c0_0] : memref<16x256xf32, #tpu.memory_space<vmem>>, vector<16x256xf32>
    %1 = arith.truncf %0 : vector<16x256xf32> to vector<16x256xbf16>
    %c0_1 = arith.constant 0 : index
    %c0_2 = arith.constant 0 : index
    %2 = vector.load %arg2[%c0_1, %c0_2] : memref<256x512xbf16, #tpu.memory_space<vmem>>, vector<256x512xbf16>
    %cst = arith.constant dense<0.000000e+00> : vector<16x512xf32>
    %3 = tpu.matmul %1, %2, %cst {dimension_numbers = #tpu.dot_dimension_numbers<[1], [0], [0], [1], [0, 0, 1, 1], [], []>} : vector<16x256xbf16>, vector<256x512xbf16>, vector<16x512xf32> -> vector<16x512xf32>
    %4 = vector.extract_strided_slice %3 {offsets = [0, 0], sizes = [16, 256], strides = [1, 1]} : vector<16x512xf32> to vector<16x256xf32>
    %5 = vector.extract_strided_slice %3 {offsets = [0, 256], sizes = [16, 256], strides = [1, 1]} : vector<16x512xf32> to vector<16x256xf32>
    %6 = arith.negf %4 : vector<16x256xf32>
    %7 = math.exp %6 : vector<16x256xf32>
    %cst_3 = arith.constant 1.000000e+00 : f32
    %8 = vector.broadcast %cst_3 : f32 to vector<16x256xf32>
    %9 = arith.addf %8, %7 : vector<16x256xf32>
    %10 = arith.divf %8, %9 : vector<16x256xf32>
    %11 = arith.mulf %4, %10 : vector<16x256xf32>
    %12 = arith.mulf %11, %5 : vector<16x256xf32>
    %13 = arith.truncf %12 : vector<16x256xf32> to vector<16x256xbf16>
    %c0_4 = arith.constant 0 : index
    %c0_5 = arith.constant 0 : index
    %14 = vector.load %arg3[%c0_4, %c0_5] : memref<256x256xbf16, #tpu.memory_space<vmem>>, vector<256x256xbf16>
    %cst_6 = arith.constant dense<0.000000e+00> : vector<16x256xf32>
    %15 = tpu.matmul %13, %14, %cst_6 {dimension_numbers = #tpu.dot_dimension_numbers<[1], [0], [0], [1], [0, 0, 1, 1], [], []>} : vector<16x256xbf16>, vector<256x256xbf16>, vector<16x256xf32> -> vector<16x256xf32>
    %16 = arith.truncf %15 : vector<16x256xf32> to vector<16x256xbf16>
    %c0_7 = arith.constant 0 : index
    %c0_8 = arith.constant 0 : index
    %17 = vector.load %arg4[%c0_7, %c0_8] : memref<16x256xbf16, #tpu.memory_space<vmem>>, vector<16x256xbf16>
    tpu.vector_store %arg4[%c0_7, %c0_8], %16 {strides = array<i32>} : memref<16x256xbf16, #tpu.memory_space<vmem>>, vector<16x256xbf16>,
    return
  }
  func.func @transform_0(%arg0: i32) -> (i32, i32) {
    %c0_i32 = arith.constant 0 : i32
    %c0_i32_0 = arith.constant 0 : i32
    return %arg0, %c0_i32 : i32, i32
  }
  func.func @transform_1(%arg0: i32) -> (i32, i32) {
    %c0_i32 = arith.constant 0 : i32
    %c0_i32_0 = arith.constant 0 : i32
    %c0_i32_1 = arith.constant 0 : i32
    return %c0_i32, %c0_i32_0 : i32, i32
  }
  func.func @transform_2(%arg0: i32) -> (i32, i32) {
    %c0_i32 = arith.constant 0 : i32
    %c0_i32_0 = arith.constant 0 : i32
    %c0_i32_1 = arith.constant 0 : i32
    return %c0_i32, %c0_i32_0 : i32, i32
  }
  func.func @transform_3(%arg0: i32) -> (i32, i32) {
    %c0_i32 = arith.constant 0 : i32
    %c0_i32_0 = arith.constant 0 : i32
    return %arg0, %c0_i32 : i32, i32
  }
}

</mosaic_0001>

<bundles_post_ra>
// kernel: tpu_custom_call.1
= control target key start
LH: loop header
LB: loop body
LE: loop exit
PB: predicated region body
PF: predicated region fallthrough
CT: control target
= control target key end

     0   :  { %8 = vsyncpa [#allocation3], 0  ;;  %s1288_s0 = inlined_call_operand.hbm [shape: f32[16,256], index: 0, kind: input, shape index: {}]   ;;  %s1289_s1 = inlined_call_operand.hbm [shape: bf16[256,512], index: 1, kind: input, shape index: {}]   ;;  %s1290_s2 = inlined_call_operand.hbm [shape: bf16[256,256], index: 2, kind: input, shape index: {}]   ;;  %s1291_s3 = inlined_call_operand.hbm [shape: bf16[16,256], index: 3, kind: output, shape index: {}]  }
   0x1   :  { %9 = vsyncpa [#allocation6], 0 }
   0x2   :  { %10 = vsyncpa [#allocation4], 0  ;;  %s1199_s12 = smov [#allocation5]   ;;  %s1200_s14 = smov [#allocation2]  }
   0x3   :  { %s28_s13 = sshll.u32 %s1199_s12, 4  ;;  %s16_s15 = sshll.u32 %s1200_s14, 4  ;;  %s29_s13 = int_to_ptr.vmem [resolvable:$true] %s28_s13  ;;  %s1227_s15 = int_to_ptr.vmem [resolvable:$true] %s16_s15 }
   0x4   :  { %s1105_s18 = scalar_lea.hbm %s1289_s1, 8192 }
   0x5   :  { %p1106_p0 = scmp.ne.s32.totalorder %s1289_s1, %s1105_s18  ;;  %p1109_p1 = scmp.lt.u32.totalorder %s1105_s18, %s1289_s1 }
   0x7   :  { %p1111_p2 = pnand %p1109_p1, %p1106_p0 }
   0x9   :  { %1114 = shalt.err (!%p1111_p2)
}
   0xa   :  { %s1115_s23 = scalar_lea.vmem %s29_s13, 8192  ;;  %p1120_p4 = scmp.lt.s32.totalorder %s29_s13, %s29_s13 }
   0xb   :  { %p1116_p3 = scmp.ne.s32.totalorder %s29_s13, %s1115_s23  ;;  %p1121_p5 = scmp.lt.s32.totalorder %s1115_s23, %s1115_s23 }
   0xd   :  { %p1122_p6 = por %p1121_p5, %p1120_p4 }
   0xf   :  { %p1123_p7 = pnand %p1122_p6, %p1116_p3 }
  0x11   :  { %1126 = shalt.err (!%p1123_p7)
}
  0x12   :  { %s1201_s24 = smov 256   ;;  %s1202_s25 = smov 16  }
  0x13   :  { %34 = dma.hbm_to_vmem [thread:$0]  %s1289_s1, 8192, %s29_s13, [#allocation6], %s1201_s24, %s1201_s24, %s1202_s25  }
  0x14   :  { %s1127_s30 = scalar_lea.hbm %s1288_s0, 512 }
  0x15   :  { %p1128_p8 = scmp.ne.s32.totalorder %s1288_s0, %s1127_s30  ;;  %p1131_p9 = scmp.lt.u32.totalorder %s1127_s30, %s1288_s0 }
  0x17   :  { %p1133_p10 = pnand %p1131_p9, %p1128_p8 }
  0x19   :  { %1136 = shalt.err (!%p1133_p10)
}
  0x1a   :  { %s1137_s8 = scalar_lea.vmem %s1227_s15, 512  ;;  %p1142_p12 = scmp.lt.s32.totalorder %s1227_s15, %s1227_s15 }
  0x1b   :  { %p1138_p11 = scmp.ne.s32.totalorder %s1227_s15, %s1137_s8  ;;  %p1143_p13 = scmp.lt.s32.totalorder %s1137_s8, %s1137_s8 }
  0x1d   :  { %p1144_p0 = por %p1143_p13, %p1142_p12 }
  0x1f   :  { %p1145_p1 = pnand %p1144_p0, %p1138_p11 }
  0x21   :  { %1148 = shalt.err (!%p1145_p1)
}
  0x22   :  { %22 = dma.hbm_to_vmem [thread:$0]  %s1288_s0, 512, %s1227_s15, [#allocation3], %s1201_s24, %s1201_s24, %s1202_s25  }
  0x23   :  { %s1203_s10 = smov [#allocation7]   ;;  %s1149_s14 = scalar_lea.hbm %s1290_s2, 4096 }
  0x24   :  { %s40_s11 = sshll.u32 %s1203_s10, 4  ;;  %p1150_p2 = scmp.ne.s32.totalorder %s1290_s2, %s1149_s14  ;;  %s41_s11 = int_to_ptr.vmem [resolvable:$true] %s40_s11 }
  0x25   :  { %p1153_p3 = scmp.lt.u32.totalorder %s1149_s14, %s1290_s2 }
  0x27   :  { %p1155_p4 = pnand %p1153_p3, %p1150_p2 }
  0x29   :  { %1158 = shalt.err (!%p1155_p4)
}
  0x2a   :  { %s1159_s20 = scalar_lea.vmem %s41_s11, 4096  ;;  %p1164_p6 = scmp.lt.s32.totalorder %s41_s11, %s41_s11 }
  0x2b   :  { %p1160_p5 = scmp.ne.s32.totalorder %s41_s11, %s1159_s20  ;;  %p1165_p7 = scmp.lt.s32.totalorder %s1159_s20, %s1159_s20 }
  0x2d   :  { %p1166_p8 = por %p1165_p7, %p1164_p6 }
  0x2f   :  { %p1167_p9 = pnand %p1166_p8, %p1160_p5 }
  0x31   :  { %1170 = shalt.err (!%p1167_p9)
}
  0x32   :  { %s1204_s0 = smov 128   ;;  %s1205_s15 = smov 8  }
  0x33   :  { %46 = dma.hbm_to_vmem [thread:$0]  %s1290_s2, 4096, %s41_s11, [#allocation6], %s1204_s0, %s1204_s0, %s1205_s15  }
  0x34   :  { %1193 = dma.done.wait [#allocation3], 512  }
  0x35   :  { %1194 = vsyncadd [#allocation3], 4294966784 }
  0x36   :  { %1195 = dma.done.wait [#allocation6], 12288  }
  0x37   :  { %1196 = vsyncadd [#allocation6], 4294955008  ;;  %v945_v0 = vld [vmem:[#allocation5 + $0x4] ss:$16 sps:$4 sm:$0xff]   ;;  %v947_v1 = vld [vmem:[#allocation5] ss:$16 sps:$4 sm:$0xff]  }
  0x38   :  { %446 = vmatprep.subr.bf16.mxu0 %v945_v0  ;;  %v948_v2 = vld [vmem:[#allocation5 + $0x24] ss:$16 sps:$4 sm:$0xff]   ;;  %v950_v3 = vld [vmem:[#allocation5 + $0x20] ss:$16 sps:$4 sm:$0xff]   ;;  %v966_v7 = vld [vmem:[#allocation5 + $0xc] ss:$16 sps:$4 sm:$0xff]  }
  0x39   :  { %447 = vmatpush1.bf16.msra.mxu0 %v947_v1  ;;  %v951_v4 = vld [vmem:[#allocation5 + $0x44] ss:$16 sps:$4 sm:$0xff]   ;;  %v953_v5 = vld [vmem:[#allocation5 + $0x40] ss:$16 sps:$4 sm:$0xff]   ;;  %v968_v8 = vld [vmem:[#allocation5 + $0x8] ss:$16 sps:$4 sm:$0xff]   ;;  %489 = vmatprep.subr.bf16.mxu1 %v966_v7 }
  0x3a   :  { %448 = vmatprep.subr.bf16.mxu0 %v948_v2  ;;  %v954_v6 = vld [vmem:[#allocation5 + $0x64] ss:$16 sps:$4 sm:$0xff]   ;;  %v956_v9 = vld [vmem:[#allocation5 + $0x60] ss:$16 sps:$4 sm:$0xff]   ;;  %v972_v11 = vld [vmem:[#allocation5 + $0x2c] ss:$16 sps:$4 sm:$0xff]   ;;  %490 = vmatpush1.bf16.msra.mxu1 %v968_v8 }
  0x3b   :  { %v957_v10 = vld [vmem:[#allocation5 + $0x84] ss:$16 sps:$4 sm:$0xff]   ;;  %v974_v12 = vld [vmem:[#allocation5 + $0x28] ss:$16 sps:$4 sm:$0xff]   ;;  %491 = vmatprep.subr.bf16.mxu1 %v972_v11  ;;  %v959_v13 = vld [vmem:[#allocation5 + $0x80] ss:$16 sps:$4 sm:$0xff]  }
  0x3c   :  { %v978_v14 = vld [vmem:[#allocation5 + $0x4c] ss:$16 sps:$4 sm:$0xff]   ;;  %v960_v15 = vld [vmem:[#allocation5 + $0xa4] ss:$16 sps:$4 sm:$0xff]   ;;  %v980_v16 = vld [vmem:[#allocation5 + $0x48] ss:$16 sps:$4 sm:$0xff]  }
  0x3d   :  { %449 = vmatpush1.bf16.msra.mxu0 %v950_v3  ;;  %v984_v17 = vld [vmem:[#allocation5 + $0x6c] ss:$16 sps:$4 sm:$0xff]   ;;  %v962_v18 = vld [vmem:[#allocation5 + $0xa0] ss:$16 sps:$4 sm:$0xff]   ;;  %v963_v19 = vld [vmem:[#allocation5 + $0xc4] ss:$16 sps:$4 sm:$0xff]  }
  0x3e   :  { %450 = vmatprep.subr.bf16.mxu0 %v951_v4  ;;  %492 = vmatpush1.bf16.msra.mxu1 %v974_v12  ;;  %v986_v20 = vld [vmem:[#allocation5 + $0x68] ss:$16 sps:$4 sm:$0xff]   ;;  %v990_v21 = vld [vmem:[#allocation5 + $0x8c] ss:$16 sps:$4 sm:$0xff]   ;;  %v965_v22 = vld [vmem:[#allocation5 + $0xc0] ss:$16 sps:$4 sm:$0xff]  }
  0x3f   :  { %493 = vmatprep.subr.bf16.mxu1 %v978_v14  ;;  %v969_v23 = vld [vmem:[#allocation5 + $0xe4] ss:$16 sps:$4 sm:$0xff]   ;;  %v992_v24 = vld [vmem:[#allocation5 + $0x88] ss:$16 sps:$4 sm:$0xff]   ;;  %v996_v25 = vld [vmem:[#allocation5 + $0xac] ss:$16 sps:$4 sm:$0xff]  }
  0x40   :  { %v971_v26 = vld [vmem:[#allocation5 + $0xe0] ss:$16 sps:$4 sm:$0xff]   ;;  %v975_v27 = vld [vmem:[#allocation5 + $0x104] ss:$16 sps:$4 sm:$0xff]   ;;  %v998_v28 = vld [vmem:[#allocation5 + $0xa8] ss:$16 sps:$4 sm:$0xff]  }
  0x41   :  { %451 = vmatpush1.bf16.msra.mxu0 %v953_v5  ;;  %v1002_v29 = vld [vmem:[#allocation5 + $0xcc] ss:$16 sps:$4 sm:$0xff]   ;;  %v977_v30 = vld [vmem:[#allocation5 + $0x100] ss:$16 sps:$4 sm:$0xff]   ;;  %v981_v31 = vld [vmem:[#allocation5 + $0x124] ss:$16 sps:$4 sm:$0xff]  }
  0x42   :  { %452 = vmatprep.subr.bf16.mxu0 %v954_v6  ;;  %494 = vmatpush1.bf16.msra.mxu1 %v980_v16  ;;  %v1004_v32 = vld [vmem:[#allocation5 + $0xc8] ss:$16 sps:$4 sm:$0xff]   ;;  %v1008_v33 = vld [vmem:[#allocation5 + $0xec] ss:$16 sps:$4 sm:$0xff]   ;;  %v983_v35 = vld [vmem:[#allocation5 + $0x120] ss:$16 sps:$4 sm:$0xff]  }
  0x43   :  { %495 = vmatprep.subr.bf16.mxu1 %v984_v17  ;;  %v57_v34 = vld [vmem:[#allocation2 + $0x8] sm:$0xff]  ;;  %v59_v36 = vld [vmem:[#allocation2 + $0x18] sm:$0xff]  ;;  %v987_v37 = vld [vmem:[#allocation5 + $0x144] ss:$16 sps:$4 sm:$0xff]   ;;  %s1206_s2 = smov [#allocation8]  }
  0x44   :  { %v61_v38 = vpack.c.bf16 %v59_v36, %v57_v34  ;;  %v1010_v39 = vld [vmem:[#allocation5 + $0xe8] ss:$16 sps:$4 sm:$0xff]   ;;  %v1014_v40 = vld [vmem:[#allocation5 + $0x10c] ss:$16 sps:$4 sm:$0xff]   ;;  %v989_v41 = vld [vmem:[#allocation5 + $0x140] ss:$16 sps:$4 sm:$0xff]  }
  0x45   :  { %453 = vmatpush1.bf16.msra.mxu0 %v956_v9  ;;  %v993_v42 = vld [vmem:[#allocation5 + $0x164] ss:$16 sps:$4 sm:$0xff]   ;;  %v1016_v43 = vld [vmem:[#allocation5 + $0x108] ss:$16 sps:$4 sm:$0xff]   ;;  %v1020_v44 = vld [vmem:[#allocation5 + $0x12c] ss:$16 sps:$4 sm:$0xff]  }
  0x46   :  { %454 = vmatprep.subr.bf16.mxu0 %v957_v10  ;;  %496 = vmatpush1.bf16.msra.mxu1 %v986_v20  ;;  %v995_v45 = vld [vmem:[#allocation5 + $0x160] ss:$16 sps:$4 sm:$0xff]   ;;  %v999_v46 = vld [vmem:[#allocation5 + $0x184] ss:$16 sps:$4 sm:$0xff]   ;;  %v1022_v47 = vld [vmem:[#allocation5 + $0x128] ss:$16 sps:$4 sm:$0xff]  }
  0x47   :  { %497 = vmatprep.subr.bf16.mxu1 %v990_v21  ;;  %478 = vmatprep.mubr.bf16.mxu0 %v61_v38  ;;  %v1023_v48 = vld [vmem:[#allocation5 + $0x14c] ss:$16 sps:$4 sm:$0xff]   ;;  %v1001_v49 = vld [vmem:[#allocation5 + $0x180] ss:$16 sps:$4 sm:$0xff]   ;;  %v1005_v50 = vld [vmem:[#allocation5 + $0x1a4] ss:$16 sps:$4 sm:$0xff]  }
  0x48   :  { %521 = vmatprep.mubr.bf16.mxu1 %v61_v38  ;;  %v1025_v51 = vld [vmem:[#allocation5 + $0x148] ss:$16 sps:$4 sm:$0xff]   ;;  %v1026_v52 = vld [vmem:[#allocation5 + $0x16c] ss:$16 sps:$4 sm:$0xff]   ;;  %v1007_v53 = vld [vmem:[#allocation5 + $0x1a0] ss:$16 sps:$4 sm:$0xff]  }
  0x49   :  { %455 = vmatpush1.bf16.msra.mxu0 %v959_v13  ;;  %v1011_v54 = vld [vmem:[#allocation5 + $0x1c4] ss:$16 sps:$4 sm:$0xff]   ;;  %v1028_v55 = vld [vmem:[#allocation5 + $0x168] ss:$16 sps:$4 sm:$0xff]   ;;  %v1013_v56 = vld [vmem:[#allocation5 + $0x1c0] ss:$16 sps:$4 sm:$0xff]  }
  0x4a   :  { %456 = vmatprep.subr.bf16.mxu0 %v960_v15  ;;  %498 = vmatpush1.bf16.msra.mxu1 %v992_v24  ;;  %v1029_v57 = vld [vmem:[#allocation5 + $0x18c] ss:$16 sps:$4 sm:$0xff]   ;;  %v1017_v58 = vld [vmem:[#allocation5 + $0x1e4] ss:$16 sps:$4 sm:$0xff]   ;;  %v1031_v59 = vld [vmem:[#allocation5 + $0x188] ss:$16 sps:$4 sm:$0xff]  }
  0x4b   :  { %499 = vmatprep.subr.bf16.mxu1 %v996_v25  ;;  %v1032_v60 = vld [vmem:[#allocation5 + $0x1ac] ss:$16 sps:$4 sm:$0xff]   ;;  %v1019_v61 = vld [vmem:[#allocation5 + $0x1e0] ss:$16 sps:$4 sm:$0xff]   ;;  %v1034_v1 = vld [vmem:[#allocation5 + $0x1a8] ss:$16 sps:$4 sm:$0xff]  }
  0x4c   :  { %v56_v62 = vld [vmem:[#allocation2] sm:$0xff]  ;;  %v58_v63 = vld [vmem:[#allocation2 + $0x10] sm:$0xff]  ;;  %v1035_v3 = vld [vmem:[#allocation5 + $0x1cc] ss:$16 sps:$4 sm:$0xff]   ;;  %s820_s23 = sshll.u32 %s1206_s2, 4  ;;  %s821_s23 = int_to_ptr.vmem [resolvable:$true] %s820_s23 }
  0x4d   :  { %457 = vmatpush1.bf16.msra.mxu0 %v962_v18  ;;  %v1043_v0 = vld [vmem:[#allocation7 + $0x4] ss:$8 sps:$4 sm:$0xff]   ;;  %v60_v2 = vpack.c.bf16 %v58_v63, %v56_v62  ;;  %v1041_v4 = vld [vmem:[#allocation7] ss:$8 sps:$4 sm:$0xff]   ;;  %v1046_v5 = vld [vmem:[#allocation7 + $0x14] ss:$8 sps:$4 sm:$0xff]   ;;  %p1176_p11 = scmp.lt.s32.totalorder %s821_s23, %s821_s23 }
  0x4e   :  { %458 = vmatprep.subr.bf16.mxu0 %v963_v19  ;;  %500 = vmatpush1.bf16.msra.mxu1 %v998_v28  ;;  %v1037_v6 = vld [vmem:[#allocation5 + $0x1c8] ss:$16 sps:$4 sm:$0xff]   ;;  %v1038_v7 = vld [vmem:[#allocation5 + $0x1ec] ss:$16 sps:$4 sm:$0xff]   ;;  %s1171_s24 = scalar_lea.vmem %s821_s23, 256 }
  0x4f   :  { %501 = vmatprep.subr.bf16.mxu1 %v1002_v29  ;;  %v1044_v8 = vld [vmem:[#allocation7 + $0x10] ss:$8 sps:$4 sm:$0xff]   ;;  %v1049_v9 = vld [vmem:[#allocation7 + $0x24] ss:$8 sps:$4 sm:$0xff]   ;;  %v1047_v11 = vld [vmem:[#allocation7 + $0x20] ss:$8 sps:$4 sm:$0xff]   ;;  %p1172_p10 = scmp.ne.s32.totalorder %s821_s23, %s1171_s24  ;;  %p1177_p12 = scmp.lt.s32.totalorder %s1171_s24, %s1171_s24 }
  0x50   :  { %v1040_v10 = vld [vmem:[#allocation5 + $0x1e8] ss:$16 sps:$4 sm:$0xff]   ;;  %v1052_v12 = vld [vmem:[#allocation7 + $0x34] ss:$8 sps:$4 sm:$0xff]   ;;  %v1055_v14 = vld [vmem:[#allocation7 + $0x44] ss:$8 sps:$4 sm:$0xff]  }
  0x51   :  { %459 = vmatpush1.bf16.msra.mxu0 %v965_v22  ;;  %v1050_v13 = vld [vmem:[#allocation7 + $0x30] ss:$8 sps:$4 sm:$0xff]   ;;  %v1053_v15 = vld [vmem:[#allocation7 + $0x40] ss:$8 sps:$4 sm:$0xff]   ;;  %v1058_v16 = vld [vmem:[#allocation7 + $0x54] ss:$8 sps:$4 sm:$0xff]   ;;  %p1178_p13 = por %p1177_p12, %p1176_p11 }
  0x52   :  { %460 = vmatprep.subr.bf16.mxu0 %v969_v23  ;;  %502 = vmatpush1.bf16.msra.mxu1 %v1004_v32  ;;  %v1056_v17 = vld [vmem:[#allocation7 + $0x50] ss:$8 sps:$4 sm:$0xff]   ;;  %v1061_v18 = vld [vmem:[#allocation7 + $0x64] ss:$8 sps:$4 sm:$0xff]   ;;  %v1059_v19 = vld [vmem:[#allocation7 + $0x60] ss:$8 sps:$4 sm:$0xff]  }
  0x53   :  { %503 = vmatprep.subr.bf16.mxu1 %v1008_v33  ;;  %v1064_v20 = vld [vmem:[#allocation7 + $0x74] ss:$8 sps:$4 sm:$0xff]   ;;  %v1062_v21 = vld [vmem:[#allocation7 + $0x70] ss:$8 sps:$4 sm:$0xff]   ;;  %v1067_v22 = vld [vmem:[#allocation7 + $0x84] ss:$8 sps:$4 sm:$0xff]   ;;  %p1179_p0 = pnand %p1178_p13, %p1172_p10 }
  0x54   :  { %v1065_v23 = vld [vmem:[#allocation7 + $0x80] ss:$8 sps:$4 sm:$0xff]   ;;  %v1070_v24 = vld [vmem:[#allocation7 + $0x94] ss:$8 sps:$4 sm:$0xff]   ;;  %v1068_v25 = vld [vmem:[#allocation7 + $0x90] ss:$8 sps:$4 sm:$0xff]  }
  0x55   :  { %461 = vmatpush1.bf16.msra.mxu0 %v971_v26  ;;  %v1073_v26 = vld [vmem:[#allocation7 + $0xa4] ss:$8 sps:$4 sm:$0xff]   ;;  %v1076_v28 = vld [vmem:[#allocation7 + $0xb4] ss:$8 sps:$4 sm:$0xff]   ;;  %v1074_v29 = vld [vmem:[#allocation7 + $0xb0] ss:$8 sps:$4 sm:$0xff]  }
  0x56   :  { %462 = vmatprep.subr.bf16.mxu0 %v975_v27  ;;  %504 = vmatpush1.bf16.msra.mxu1 %v1010_v39  ;;  %v1071_v27 = vld [vmem:[#allocation7 + $0xa0] ss:$8 sps:$4 sm:$0xff]   ;;  %v1082_v32 = vld [vmem:[#allocation7 + $0xd4] ss:$8 sps:$4 sm:$0xff]   ;;  %v1080_v33 = vld [vmem:[#allocation7 + $0xd0] ss:$8 sps:$4 sm:$0xff]  }
  0x57   :  { %505 = vmatprep.subr.bf16.mxu1 %v1014_v40  ;;  %v1085_v34 = vld [vmem:[#allocation7 + $0xe4] ss:$8 sps:$4 sm:$0xff]   ;;  %v1088_v36 = vld [vmem:[#allocation7 + $0xf4] ss:$8 sps:$4 sm:$0xff]  }
  0x59   :  { %463 = vmatpush1.bf16.msra.mxu0 %v977_v30  ;;  %v1079_v30 = vld [vmem:[#allocation7 + $0xc4] ss:$8 sps:$4 sm:$0xff]  }
  0x5a   :  { %464 = vmatprep.subr.bf16.mxu0 %v981_v31  ;;  %506 = vmatpush1.bf16.msra.mxu1 %v1016_v43  ;;  %v1077_v31 = vld [vmem:[#allocation7 + $0xc0] ss:$8 sps:$4 sm:$0xff]  }
  0x5b   :  { %507 = vmatprep.subr.bf16.mxu1 %v1020_v44 }
  0x5d   :  { %465 = vmatpush1.bf16.msra.mxu0 %v983_v35  ;;  %v1083_v35 = vld [vmem:[#allocation7 + $0xe0] ss:$8 sps:$4 sm:$0xff]  }
  0x5e   :  { %466 = vmatprep.subr.bf16.mxu0 %v987_v37  ;;  %508 = vmatpush1.bf16.msra.mxu1 %v1022_v47  ;;  %v1086_v37 = vld [vmem:[#allocation7 + $0xf0] ss:$8 sps:$4 sm:$0xff]  }
  0x5f   :  { %509 = vmatprep.subr.bf16.mxu1 %v1023_v48 }
  0x61   :  { %467 = vmatpush1.bf16.msra.mxu0 %v989_v41 }
  0x62   :  { %468 = vmatprep.subr.bf16.mxu0 %v993_v42  ;;  %510 = vmatpush1.bf16.msra.mxu1 %v1025_v51 }
  0x63   :  { %511 = vmatprep.subr.bf16.mxu1 %v1026_v52 }
  0x65   :  { %469 = vmatpush1.bf16.msra.mxu0 %v995_v45 }
  0x66   :  { %470 = vmatprep.subr.bf16.mxu0 %v999_v46  ;;  %512 = vmatpush1.bf16.msra.mxu1 %v1028_v55 }
  0x67   :  { %513 = vmatprep.subr.bf16.mxu1 %v1029_v57 }
  0x69   :  { %471 = vmatpush1.bf16.msra.mxu0 %v1001_v49 }
  0x6a   :  { %472 = vmatprep.subr.bf16.mxu0 %v1005_v50  ;;  %514 = vmatpush1.bf16.msra.mxu1 %v1031_v59 }
  0x6b   :  { %515 = vmatprep.subr.bf16.mxu1 %v1032_v60 }
  0x6d   :  { %473 = vmatpush1.bf16.msra.mxu0 %v1007_v53 }
  0x6e   :  { %474 = vmatprep.subr.bf16.mxu0 %v1011_v54  ;;  %516 = vmatpush1.bf16.msra.mxu1 %v1034_v1 }
  0x6f   :  { %517 = vmatprep.subr.bf16.mxu1 %v1035_v3 }
  0x71   :  { %475 = vmatpush1.bf16.msra.mxu0 %v1013_v56 }
  0x72   :  { %476 = vmatprep.subr.bf16.mxu0 %v1017_v58  ;;  %518 = vmatpush1.bf16.msra.mxu1 %v1037_v6 }
  0x73   :  { %519 = vmatprep.subr.bf16.mxu1 %v1038_v7 }
  0x75   :  { %477 = vmatpush1.bf16.msra.mxu0 %v1019_v61 }
  0x76   :  { %758 = vmatprep.subr.bf16.mxu0 %v1043_v0  ;;  %520 = vmatpush1.bf16.msra.mxu1 %v1040_v10 }
  0x78   :  { %479 = vmatmul.mubr.bf16.vlgmr.msra.gmra.mrb[0].mxu0 %v60_v2 }
  0x79   :  { %759 = vmatpush1.bf16.msra.mxu0 %v1041_v4  ;;  %522 = vmatmul.mubr.bf16.vlgmr.msra.gmra.mrb[0].mxu1 %v60_v2 }
  0x7a   :  { %760 = vmatprep.subr.bf16.mxu0 %v1046_v5 }
  0x7d   :  { %761 = vmatpush1.bf16.msra.mxu0 %v1044_v8 }
  0x7e   :  { %762 = vmatprep.subr.bf16.mxu0 %v1049_v9 }
  0x81   :  { %763 = vmatpush1.bf16.msra.mxu0 %v1047_v11 }
  0x82   :  { %764 = vmatprep.subr.bf16.mxu0 %v1052_v12 }
  0x85   :  { %765 = vmatpush1.bf16.msra.mxu0 %v1050_v13 }
  0x86   :  { %766 = vmatprep.subr.bf16.mxu0 %v1055_v14 }
  0x89   :  { %767 = vmatpush1.bf16.msra.mxu0 %v1053_v15 }
  0x8a   :  { %768 = vmatprep.subr.bf16.mxu0 %v1058_v16 }
  0x8d   :  { %769 = vmatpush1.bf16.msra.mxu0 %v1056_v17 }
  0x8e   :  { %770 = vmatprep.subr.bf16.mxu0 %v1061_v18 }
  0x91   :  { %771 = vmatpush1.bf16.msra.mxu0 %v1059_v19 }
  0x92   :  { %772 = vmatprep.subr.bf16.mxu0 %v1064_v20 }
  0x95   :  { %773 = vmatpush1.bf16.msra.mxu0 %v1062_v21 }
  0x96   :  { %774 = vmatprep.subr.bf16.mxu0 %v1067_v22 }
  0x99   :  { %775 = vmatpush1.bf16.msra.mxu0 %v1065_v23 }
  0x9a   :  { %776 = vmatprep.subr.bf16.mxu0 %v1070_v24 }
  0x9d   :  { %777 = vmatpush1.bf16.msra.mxu0 %v1068_v25 }
  0x9e   :  { %778 = vmatprep.subr.bf16.mxu0 %v1073_v26 }
  0xa1   :  { %779 = vmatpush1.bf16.msra.mxu0 %v1071_v27 }
  0xa2   :  { %780 = vmatprep.subr.bf16.mxu0 %v1076_v28 }
  0xa5   :  { %781 = vmatpush1.bf16.msra.mxu0 %v1074_v29 }
  0xa6   :  { %782 = vmatprep.subr.bf16.mxu0 %v1079_v30 }
  0xa9   :  { %783 = vmatpush1.bf16.msra.mxu0 %v1077_v31 }
  0xaa   :  { %784 = vmatprep.subr.bf16.mxu0 %v1082_v32 }
  0xad   :  { %785 = vmatpush1.bf16.msra.mxu0 %v1080_v33 }
  0xae   :  { %786 = vmatprep.subr.bf16.mxu0 %v1085_v34 }
  0xb1   :  { %787 = vmatpush1.bf16.msra.mxu0 %v1083_v35 }
  0xb2   :  { %788 = vmatprep.subr.bf16.mxu0 %v1088_v36 }
  0xb5   :  { %789 = vmatpush1.bf16.msra.mxu0 %v1086_v37 }
 0x14b   :  { %v480_v38 = vpop.f32.mrb[0].mxu0 }
 0x14c   :  { %v897_v39 = vmul.f32 -1.442695, %v480_v38  ;;  %v482_v40 = vpop.f32.mrb[1].mxu0  ;;  %v523_v46 = vpop.f32.mrb[0].mxu1 }
 0x14d   :  { %v898_v41 = vmul.f32 -1.442695, %v482_v40  ;;  %v484_v42 = vpop.f32.mrb[2].mxu0  ;;  %v525_v47 = vpop.f32.mrb[1].mxu1 }
 0x14e   :  { %1089 = vpow2.f32 %v897_v39  ;;  %v899_v43 = vmul.f32 -1.442695, %v484_v42  ;;  %v486_v44 = vpop.f32.mrb[3].mxu0  ;;  %v527_v48 = vpop.f32.mrb[2].mxu1 }
 0x14f   :  { %1091 = vpow2.f32 %v898_v41  ;;  %v900_v45 = vmul.f32 -1.442695, %v486_v44  ;;  %v529_v50 = vpop.f32.mrb[3].mxu1 }
 0x150   :  { %1093 = vpow2.f32 %v899_v43 }
 0x151   :  { %1095 = vpow2.f32 %v900_v45 }
 0x158   :  { %v1090_v49 = vpop.eup %1089 }
 0x159   :  { %v1092_v51 = vpop.eup %1091  ;;  %v544_v52 = vadd.f32 1.0, %v1090_v49 }
 0x15a   :  { %v1094_v53 = vpop.eup %1093  ;;  %v545_v54 = vadd.f32 1.0, %v1092_v51 }
 0x15b   :  { %v1096_v55 = vpop.eup %1095  ;;  %1097 = vrcp.f32 %v544_v52  ;;  %v546_v56 = vadd.f32 1.0, %v1094_v53 }
 0x15c   :  { %1099 = vrcp.f32 %v545_v54  ;;  %v547_v57 = vadd.f32 1.0, %v1096_v55 }
 0x15d   :  { %1101 = vrcp.f32 %v546_v56 }
 0x15e   :  { %1103 = vrcp.f32 %v547_v57 }
 0x165   :  { %v1098_v58 = vpop.eup %1097 }
 0x166   :  { %v1100_v59 = vpop.eup %1099  ;;  %v556_v60 = vmul.f32 %v1098_v58, %v480_v38 }
 0x167   :  { %v1102_v61 = vpop.eup %1101  ;;  %v557_v62 = vmul.f32 %v1100_v59, %v482_v40 }
 0x168   :  { %v1104_v63 = vpop.eup %1103  ;;  %v558_v0 = vmul.f32 %v1102_v61, %v484_v42  ;;  %v560_v1 = vmul.f32 %v556_v60, %v523_v46 }
 0x169   :  { %v559_v2 = vmul.f32 %v1104_v63, %v486_v44  ;;  %v561_v3 = vmul.f32 %v557_v62, %v525_v47 }
 0x16a   :  { %v562_v4 = vmul.f32 %v558_v0, %v527_v48 }
 0x16b   :  { %v563_v5 = vmul.f32 %v559_v2, %v529_v50 }
 0x16c   :  { %v564_v6 = vpack.c.bf16 %v562_v4, %v560_v1 }
 0x16d   :  { %v565_v7 = vpack.c.bf16 %v563_v5, %v561_v3 }
 0x16f   :  { %790 = vmatprep.mubr.bf16.mxu0 %v565_v7 }
 0x170   :  { %791 = vmatmul.mubr.bf16.vlgmr.msra.gmra.mrb[4].mxu0 %v564_v6 }
 0x243   :  { %v792_v8 = vpop.f32.mrb[4].mxu0 }
 0x244   :  { %v794_v9 = vpop.f32.mrb[5].mxu0 }
 0x245   :  { %v935_v10 = vpack.c.bf16 %v794_v9, %v792_v8  ;;  %v796_v11 = vpop.f32.mrb[6].mxu0 }
 0x246   :  { %v798_v12 = vpop.f32.mrb[7].mxu0 }
 0x247   :  { %813 = vst [vmem:[#allocation8] sm:$0xff] %v935_v10  ;;  %v936_v13 = vpack.c.bf16 %v798_v12, %v796_v11 }
 0x249   :  { %814 = vst [vmem:[#allocation8 + $0x8] sm:$0xff] %v936_v13 }
 0x24a   :  { %1182 = shalt.err (!%p1179_p0)
}
 0x24b   :  { %s1183_s27 = scalar_lea.hbm %s1291_s3, 256 }
 0x24c   :  { %p1184_p1 = scmp.ne.s32.totalorder %s1291_s3, %s1183_s27  ;;  %p1187_p2 = scmp.lt.u32.totalorder %s1183_s27, %s1291_s3 }
 0x24e   :  { %p1189_p3 = pnand %p1187_p2, %p1184_p1 }
 0x250   :  { %1192 = shalt.err (!%p1189_p3)
}
 0x251   :  { %826 = dma.vmem_to_hbm [thread:$0]  %s821_s23, 256, %s1291_s3, [#allocation4], %s1204_s0, %s1204_s0, %s1205_s15  }
 0x252   :  { %1197 = dma.done.wait [#allocation4], 256  }
 0x253   :  { %1198 = vsyncadd [#allocation4], 4294967040 }
 0x254   :  { %830 = vsyncpa [#allocation3], 1 }
 0x255   :  { %831 = vsyncpa [#allocation6], 1 }
 0x256   :  { %832 = vsyncpa [#allocation4], 1 }

</bundles_post_ra>
